<compile_context>
chip_gen: v7x
topology: tpu7x:2x2x1
jax: 0.10.0
libtpu: 0.0.40
codegen_flags: <defaults>
</compile_context>

<pallas_src>
import math

import jax
import jax.numpy as jnp
from jax import lax
from jax.experimental import pallas as pl
from jax.experimental.pallas import tpu as pltpu


def _round_up(x, m):
    return (x + m - 1) // m * m


# ---------------------------------------------------------------------------
# Kernel 1: fused multi-level diff bank + argmin.
#   Inputs are the level-concatenated, 1/sqrt(D_l)-scaled features / memory
#   bank (bf16), tiled along the reduction axis.  diff = ||m||^2 - 2 x.m
#   (the row-constant ||x||^2 is omitted; argmin is unchanged).
# ---------------------------------------------------------------------------
def _diff_argmin_kernel(x_ref, mem_ref, msq_ref, idx_ref, acc_ref):
    k = pl.program_id(0)

    @pl.when(k == 0)
    def _():
        acc_ref[...] = jnp.zeros_like(acc_ref)

    # Cross term on the MXU (bf16 in, f32 accumulate).
    acc_ref[...] += lax.dot_general(
        x_ref[...], mem_ref[...], (((1,), (1,)), ((), ())),
        preferred_element_type=jnp.float32)

    @pl.when(k == pl.num_programs(0) - 1)
    def _():
        # NOTE: the ||x||^2 - 2x.m + ||m||^2 expansion (and bf16 cross term)
        # only affects the *selection*; near-ties could in principle flip the
        # argmin vs. an exact mean((x-m)^2).  Acceptable for selection.
        diff = msq_ref[...] - 2.0 * acc_ref[...]                  # (B, M) f32
        nmem = diff.shape[-1]
        minv = jnp.min(diff, axis=-1, keepdims=True)              # (B, 1)
        ids = lax.broadcasted_iota(jnp.int32, diff.shape, 1)      # (B, M)
        # first-minimum tie-break == torch/jnp argmin semantics
        idx = jnp.min(jnp.where(diff == minv, ids, nmem),
                      axis=-1, keepdims=True)
        idx_ref[...] = idx.astype(jnp.int32)


def fused_diff_argmin(x_cat, mem_cat, msq, *, tk=512):
    """x_cat: (B, Dp) bf16, mem_cat: (M, Dp) bf16, msq: (1, M) f32 -> (B,) i32."""
    B, Dp = x_cat.shape
    M = mem_cat.shape[0]
    assert Dp % tk == 0
    nk = Dp // tk

    idx = pl.pallas_call(
        _diff_argmin_kernel,
        out_shape=jax.ShapeDtypeStruct((B, 1), jnp.int32),
        grid_spec=pltpu.PrefetchScalarGridSpec(
            num_scalar_prefetch=0,
            grid=(nk,),
            in_specs=[
                pl.BlockSpec((B, tk), lambda k: (0, k)),
                pl.BlockSpec((M, tk), lambda k: (0, k)),
                pl.BlockSpec((1, M), lambda k: (0, 0)),
            ],
            out_specs=pl.BlockSpec((B, 1), lambda k: (0, 0)),
            scratch_shapes=[pltpu.VMEM((B, M), jnp.float32)],
        ),
        compiler_params=pltpu.CompilerParams(
            dimension_semantics=("arbitrary",)),
    )(x_cat, mem_cat, msq)
    return idx.reshape(B)


# ---------------------------------------------------------------------------
# Kernel 2: per-batch gather of the selected memory sample (scalar-prefetched
#   indices drive the memory BlockSpec), squared difference, channel concat —
#   written as two lane-dense half-writes over a channel-major flat layout.
# ---------------------------------------------------------------------------
def _select_cat_kernel(idx_ref, x_ref, mem_ref, out_ref):
    del idx_ref                              # consumed by the index_maps
    x = x_ref[...]                           # (1, 1, CHW)  features[b]
    m = mem_ref[...]                         # (1, 1, CHW)  memory[idx[b]]
    chw = x.shape[-1]
    # Channel-major flatten => these two half-writes are exactly the channel
    # concat [x ; (m-x)^2]. 128-aligned slices -> unmasked stores.
    out_ref[:, :, :chw] = x
    out_ref[:, :, chw:] = (m - x) ** 2       # f32 elementwise (v5e-safe)


def select_and_concat(x, mem, idx):
    """x: (B, C, H, W), mem: (M, C, H, W), idx: (B,) int32 -> (B, 2C, H, W)."""
    B, C, H, W = x.shape
    M = mem.shape[0]
    chw = C * H * W
    x3 = x.reshape(B, 1, chw)
    mem3 = mem.reshape(M, 1, chw)

    out = pl.pallas_call(
        _select_cat_kernel,
        out_shape=jax.ShapeDtypeStruct((B, 1, 2 * chw), x.dtype),
        grid_spec=pltpu.PrefetchScalarGridSpec(
            num_scalar_prefetch=1,
            grid=(B,),
            in_specs=[
                pl.BlockSpec((1, 1, chw), lambda b, idx_ref: (b, 0, 0)),
                pl.BlockSpec((1, 1, chw), lambda b, idx_ref: (idx_ref[b], 0, 0)),
            ],
            out_specs=pl.BlockSpec((1, 1, 2 * chw), lambda b, idx_ref: (b, 0, 0)),
        ),
        compiler_params=pltpu.CompilerParams(
            dimension_semantics=("parallel",)),   # v7x: shard batch over 2 TCs
    )(idx, x3, mem3)
    return out.reshape(B, 2 * C, H, W)


# ---------------------------------------------------------------------------
# Bank / feature preparation (pure layout plumbing, fused by XLA).
# ---------------------------------------------------------------------------
def prepare_memory_bank(memory, *, tk=512):
    """Scale each level by 1/sqrt(D_l), concat along D, pad to TK, cast bf16.

    The memory bank is a fixed buffer in the original module, so this (and the
    ||mem||^2 precompute) runs once, not per forward call.
    """
    M = memory[0].shape[0]
    scaled = []
    for mem in memory:
        d = math.prod(mem.shape[1:])
        scaled.append(mem.reshape(M, -1).astype(jnp.float32)
                      * jnp.float32(1.0 / math.sqrt(d)))
    mem_cat = jnp.concatenate(scaled, axis=1)                 # (M, D) f32
    D = mem_cat.shape[1]
    Dp = _round_up(D, tk)
    msq = jnp.sum(mem_cat * mem_cat, axis=1).reshape(1, M)    # (1, M) f32
    mem_cat = jnp.pad(mem_cat, ((0, 0), (0, Dp - D))).astype(jnp.bfloat16)
    return mem_cat, msq, Dp


def _prepare_features(features, d_pad):
    B = features[0].shape[0]
    scaled = []
    for x in features:
        d = math.prod(x.shape[1:])
        scaled.append(x.reshape(B, -1).astype(jnp.float32)
                      * jnp.float32(1.0 / math.sqrt(d)))
    x_cat = jnp.concatenate(scaled, axis=1)
    D = x_cat.shape[1]
    x_cat = jnp.pad(x_cat, ((0, 0), (0, d_pad - D))).astype(jnp.bfloat16)
    return x_cat


# ---------------------------------------------------------------------------
# MemoryBlock.forward
# ---------------------------------------------------------------------------
def memory_block_forward(features, memory, *, tk=512):
    """features: list of (B, C_l, H_l, W_l); memory: list of (M, C_l, H_l, W_l)."""
    mem_cat, msq, d_pad = prepare_memory_bank(memory, tk=tk)
    x_cat = _prepare_features(features, d_pad)
    idx = fused_diff_argmin(x_cat, mem_cat, msq, tk=tk)       # (B,) int32
    return [select_and_concat(x, mem, idx) for x, mem in zip(features, memory)]


# Pure-JAX reference for verification.
def memory_block_forward_ref(features, memory):
    B = features[0].shape[0]
    M = memory[0].shape[0]
    diff_bank = jnp.zeros((B, M), jnp.float32)
    for x, mem in zip(features, memory):
        d = jnp.mean((x[:, None] - mem[None]) ** 2, axis=(2, 3, 4))
        diff_bank = diff_bank + d
    idx = jnp.argmin(diff_bank, axis=1)
    outs = []
    for x, mem in zip(features, memory):
        sel = mem[idx]
        outs.append(jnp.concatenate([x, (sel - x) ** 2], axis=1))
    return outs


if __name__ == "__main__":
    key = jax.random.PRNGKey(0)
    B = 2                    # batch
    M = 8                    # nb_memory_sample
    # Two memory levels (features[1:-1] of a backbone): (C, H, W) per level.
    level_shapes = [(4, 16, 16), (8, 8, 8)]

    features, memory = [], []
    for (C, H, W) in level_shapes:
        key, k1, k2 = jax.random.split(key, 3)
        features.append(jax.random.normal(k1, (B, C, H, W), jnp.float32))
        # deterministic synthetic memory bank (stand-in for _enter_in()).
        memory.append(jax.random.normal(k2, (M, C, H, W), jnp.float32))

    outs = memory_block_forward(features, memory)
    outs = [jax.block_until_ready(o) for o in outs]

    refs = memory_block_forward_ref(features, memory)
    for o, r, (C, H, W) in zip(outs, refs, level_shapes):
        assert o.shape == (B, 2 * C, H, W), o.shape
        assert jnp.allclose(o, r, rtol=1e-4, atol=1e-4), "mismatch vs reference"

    print("KERNEL_OK")
</pallas_src>

<mosaic_0001>
module attributes {stable_mosaic.version = 11 : i64} {
  func.func @_diff_argmin_kernel(%arg0: i32, %arg1: memref<2x512xbf16, #tpu.memory_space<vmem>>, %arg2: memref<8x512xbf16, #tpu.memory_space<vmem>>, %arg3: memref<1x8xf32, #tpu.memory_space<vmem>>, %arg4: memref<2x1xi32, #tpu.memory_space<vmem>>, %arg5: memref<2x8xf32, #tpu.memory_space<vmem>>) attributes {dimension_semantics = [#tpu.dimension_semantics<arbitrary>], iteration_bounds = array<i64: 3>, scalar_prefetch = 0 : i64, scratch_operands = 1 : i64, tpu.core_type = #tpu.core_type<tc>, window_params = [{transform_indices = @transform_0, window_bounds = array<i64: 2, 512>}, {transform_indices = @transform_1, window_bounds = array<i64: 8, 512>}, {pipeline_mode = #tpu.pipeline_mode<synchronous>, transform_indices = @transform_2, window_bounds = array<i64: 1, 8>}, {pipeline_mode = #tpu.pipeline_mode<synchronous>, transform_indices = @transform_3, window_bounds = array<i64: 2, 1>}]} {
    %c0_i32 = arith.constant 0 : i32
    %0 = arith.cmpi eq, %arg0, %c0_i32 : i32
    %1 = arith.extui %0 : i1 to i32
    %c0_i32_0 = arith.constant 0 : i32
    %2 = arith.cmpi ne, %1, %c0_i32_0 : i32
    scf.if %2 {
      %cst_9 = arith.constant 0.000000e+00 : f32
      %12 = vector.broadcast %cst_9 : f32 to vector<2x8xf32>
      %c0_10 = arith.constant 0 : index
      %c0_11 = arith.constant 0 : index
      %13 = vector.load %arg5[%c0_10, %c0_11] : memref<2x8xf32, #tpu.memory_space<vmem>>, vector<2x8xf32>
      tpu.vector_store %arg5[%c0_10, %c0_11], %12 {strides = array<i32>} : memref<2x8xf32, #tpu.memory_space<vmem>>, vector<2x8xf32>,
    } else {
    }
    %c0 = arith.constant 0 : index
    %c0_1 = arith.constant 0 : index
    %3 = vector.load %arg5[%c0, %c0_1] : memref<2x8xf32, #tpu.memory_space<vmem>>, vector<2x8xf32>
    %c0_2 = arith.constant 0 : index
    %c0_3 = arith.constant 0 : index
    %4 = vector.load %arg1[%c0_2, %c0_3] : memref<2x512xbf16, #tpu.memory_space<vmem>>, vector<2x512xbf16>
    %c0_4 = arith.constant 0 : index
    %c0_5 = arith.constant 0 : index
    %5 = vector.load %arg2[%c0_4, %c0_5] : memref<8x512xbf16, #tpu.memory_space<vmem>>, vector<8x512xbf16>
    %cst = arith.constant dense<0.000000e+00> : vector<2x8xf32>
    %6 = tpu.matmul %4, %5, %cst {dimension_numbers = #tpu.dot_dimension_numbers<[1], [1], [0], [0], [0, 0, 1, 0], [], []>} : vector<2x512xbf16>, vector<8x512xbf16>, vector<2x8xf32> -> vector<2x8xf32>
    %7 = arith.addf %3, %6 : vector<2x8xf32>
    %c0_6 = arith.constant 0 : index
    %c0_7 = arith.constant 0 : index
    %8 = vector.load %arg5[%c0_6, %c0_7] : memref<2x8xf32, #tpu.memory_space<vmem>>, vector<2x8xf32>
    tpu.vector_store %arg5[%c0_6, %c0_7], %7 {strides = array<i32>} : memref<2x8xf32, #tpu.memory_space<vmem>>, vector<2x8xf32>,
    %c2_i32 = arith.constant 2 : i32
    %9 = arith.cmpi eq, %arg0, %c2_i32 : i32
    %10 = arith.extui %9 : i1 to i32
    %c0_i32_8 = arith.constant 0 : i32
    %11 = arith.cmpi ne, %10, %c0_i32_8 : i32
    scf.if %11 {
      %c0_9 = arith.constant 0 : index
      %c0_10 = arith.constant 0 : index
      %12 = vector.load %arg3[%c0_9, %c0_10] : memref<1x8xf32, #tpu.memory_space<vmem>>, vector<1x8xf32>
      %c0_11 = arith.constant 0 : index
      %c0_12 = arith.constant 0 : index
      %13 = vector.load %arg5[%c0_11, %c0_12] : memref<2x8xf32, #tpu.memory_space<vmem>>, vector<2x8xf32>
      %cst_13 = arith.constant 2.000000e+00 : f32
      %14 = vector.broadcast %cst_13 : f32 to vector<2x8xf32>
      %15 = arith.mulf %14, %13 : vector<2x8xf32>
      %16 = vector.broadcast %12 : vector<1x8xf32> to vector<2x8xf32>
      %17 = arith.subf %16, %15 : vector<2x8xf32>
      %cst_14 = arith.constant dense<0x7F800000> : vector<2xf32>
      %18 = vector.multi_reduction <minimumf>, %17, %cst_14 [1] : vector<2x8xf32> to vector<2xf32>
      %19 = vector.shape_cast %18 : vector<2xf32> to vector<2x1xf32>
      %20 = tpu.iota {dimensions = array<i32: 1>} : vector<2x8xi32>
      %21 = vector.broadcast %19 : vector<2x1xf32> to vector<2x8xf32>
      %22 = arith.cmpf oeq, %17, %21 : vector<2x8xf32>
      %c8_i32 = arith.constant 8 : i32
      %23 = vector.broadcast %c8_i32 : i32 to vector<2x8xi32>
      %24 = arith.select %22, %20, %23 : vector<2x8xi1>, vector<2x8xi32>
      %cst_15 = arith.constant dense<2147483647> : vector<2xi32>
      %25 = vector.multi_reduction <minsi>, %24, %cst_15 [1] : vector<2x8xi32> to vector<2xi32>
      %26 = vector.shape_cast %25 : vector<2xi32> to vector<2x1xi32>
      %c0_16 = arith.constant 0 : index
      %c0_17 = arith.constant 0 : index
      %27 = vector.load %arg4[%c0_16, %c0_17] : memref<2x1xi32, #tpu.memory_space<vmem>>, vector<2x1xi32>
      tpu.vector_store %arg4[%c0_16, %c0_17], %26 {strides = array<i32>} : memref<2x1xi32, #tpu.memory_space<vmem>>, vector<2x1xi32>,
    } else {
    }
    return
  }
  func.func @transform_0(%arg0: i32) -> (i32, i32) {
    %c0_i32 = arith.constant 0 : i32
    %c0_i32_0 = arith.constant 0 : i32
    return %c0_i32, %arg0 : i32, i32
  }
  func.func @transform_1(%arg0: i32) -> (i32, i32) {
    %c0_i32 = arith.constant 0 : i32
    %c0_i32_0 = arith.constant 0 : i32
    return %c0_i32, %arg0 : i32, i32
  }
  func.func @transform_2(%arg0: i32) -> (i32, i32) {
    %c0_i32 = arith.constant 0 : i32
    %c0_i32_0 = arith.constant 0 : i32
    %c0_i32_1 = arith.constant 0 : i32
    return %c0_i32, %c0_i32_0 : i32, i32
  }
  func.func @transform_3(%arg0: i32) -> (i32, i32) {
    %c0_i32 = arith.constant 0 : i32
    %c0_i32_0 = arith.constant 0 : i32
    %c0_i32_1 = arith.constant 0 : i32
    return %c0_i32, %c0_i32_0 : i32, i32
  }
}

</mosaic_0001>

<bundles_post_ra>
// kernel: tpu_custom_call.1
= control target key start
LH: loop header
LB: loop body
LE: loop exit
PB: predicated region body
PF: predicated region fallthrough
CT: control target
= control target key end

     0   :  { %8 = vsyncpa [#allocation4], 0  ;;  %s803_s0 = inlined_call_operand.hbm [shape: bf16[2,1536], index: 0, kind: input, shape index: {}]   ;;  %s804_s1 = inlined_call_operand.hbm [shape: bf16[8,1536], index: 1, kind: input, shape index: {}]   ;;  %s805_s2 = inlined_call_operand.vmem [shape: f32[1,8], index: 2, kind: input, shape index: {}]   ;;  %s806_s3 = inlined_call_operand.vmem [shape: s32[2,1], index: 3, kind: output, shape index: {}]  }
   0x1   :  { %10 = vsyncpa [#allocation4 + $0x1], 0 }
   0x2   :  { %11 = vsyncpa [#allocation6], 0 }
   0x3   :  { %13 = vsyncpa [#allocation6 + $0x1], 0  ;;  %s649_s12 = smov 0   ;;  %s651_s13 = smov 0  }
   0x4   :  { %s653_s14 = smov 0   ;;  %s655_s15 = smov 0  }
   0x5 LB: > { %s668_s16 = sadd.s32 4294967295, %s623_s15   ;;  %s671_s17 = sadd.s32 1, %s623_s15   ;;  %s623_s15 = sphi %s655_s15, %s818_s15   ;;  %s619_s14 = sphi %s653_s14, %s817_s14   ;;  %s615_s13 = sphi %s651_s13, %s816_s13   ;;  %s611_s12 = sphi %s649_s12, %s815_s12  }
   0x6   : > { %s23_s18 = ssub.s32 %s623_s15, %s671_s17  ;;  %s26_s19 = sadd.s32 1, %s619_s14 }
   0x7   : > { %p24_p0 = scmp.eq.s32.totalorder %s23_s18, 0  ;;  %p33_p1 = scmp.ne.s32.totalorder %s619_s14, %s615_s13 }
   0x8   : > { %p34_p2 = scmp.eq.s32.totalorder %s623_s15, 0  ;;  %p39_p3 = scmp.ne.s32.totalorder %s615_s13, %s611_s12 }
   0x9   : > { %s681_s20 = scalar_select %p24_p0, %s619_s14, %s26_s19  }
   0xa   : > { %p35_p4 = por %p34_p2, %p33_p1  ;;  %p40_p5 = scmp.eq.s32.totalorder %s668_s16, 0 }
   0xb   : > { %p486_p6 = scmp.lt.s32.totalorder %s623_s15, 3  ;;  %s690_s22 = sand.u32 1, %s619_s14  }
   0xc   : > { %p685_p7 = por %p40_p5, %p39_p3  ;;  %s454_s23 = sshll.u32 %s690_s22, 2 }
   0xd   : > { %s473_s24 = sshll.u32 %s623_s15, 6  ;;  %s138_s28 = scalar_lea.vmem [#allocation3], %s454_s23 }
   0xe   : > { %s808_s21 = scalar_select %p685_p7, 1, 0 }
   0xf   : > { %s697_s27 = scalar_lea.hbm %s803_s0, %s473_s24  ;;  %s146_s29 = sshll.u32 %s138_s28, 4  ;;  %s699_s29 = int_to_ptr.vmem [resolvable:$true] %s146_s29 }
  0x10   : > { %p701_p8 = pnand %p486_p6, %p35_p4  ;;  %s135_s4 = scalar_lea.sflag [#allocation4], %s690_s22 }
  0x11   : > { %s525_s5 = scalar_lea.hbm %s697_s27, 64  ;;  %s530_s8 = scalar_lea.hbm %s803_s0, 192 }
  0x12   : > { %p526_p11 = scmp.ne.s32.totalorder %s697_s27, %s525_s5  ;;  %p527_p12 = pneg %p701_p8 }
  0x13   : > { %p531_p1 = scmp.lt.u32.totalorder %s697_s27, %s803_s0  ;;  %p532_p2 = scmp.lt.u32.totalorder %s530_s8, %s525_s5 }
  0x14   : > { %p528_p13 = pnand %p527_p12, %p526_p11  ;;  %p534_p4 = scmp.lt.u32.totalorder %s525_s5, %s697_s27 }
  0x15   : > { %p533_p3 = por %p532_p2, %p531_p1 }
  0x16   : > { %p529_p0 = pneg %p528_p13 }
  0x17   : > { %p535_p5 = por %p534_p4, %p533_p3 }
  0x19   : > { %p536_p6 = pnand %p535_p5, %p529_p0 }
  0x1b   : > { %539 = shalt.err (!%p536_p6)
}
  0x1c   : > { %s540_s11 = scalar_lea.vmem %s699_s29, 64  ;;  %s625_s12 = smov [#allocation3]  }
  0x1d   : > { %p541_p11 = scmp.ne.s32.totalorder %s699_s29, %s540_s11  ;;  %s545_s18 = sshll.u32 %s625_s12, 4  ;;  %s546_s18 = int_to_ptr.vmem [resolvable:$false] %s545_s18 }
  0x1e   : > { %s547_s19 = scalar_lea.vmem %s546_s18, 128  ;;  %p548_p10 = scmp.lt.s32.totalorder %s699_s29, %s546_s18 }
  0x1f   : > { %p543_p13 = pnand %p541_p11, %p527_p12  ;;  %p549_p1 = scmp.lt.s32.totalorder %s547_s19, %s540_s11 }
  0x21   : > { %p544_p9 = pneg %p543_p13  ;;  %p550_p2 = por %p549_p1, %p548_p10 }
  0x23   : > { %p551_p3 = pnand %p550_p2, %p544_p9 }
  0x25   : > { %554 = shalt.err (!%p551_p3)
}
  0x26   : > { %482 = dma.hbm_to_vmem [thread:$0]  (!%p701_p8), %s697_s27, 64, %s699_s29, %s135_s4  }
  0x27   : > { %p810_p0 = scmp.lt.s32.totalorder %s623_s15, 4  ;;  %p811_p4 = scmp.ge.s32.totalorder %s623_s15, 1 }
  0x28   : > { %s457_s24 = sshll.u32 %s690_s22, 4  ;;  %s474_s25 = sshll.u32 %s623_s15, 8 }
  0x29   : > { %p737_p5 = pnand %p811_p4, %p810_p0  ;;  %s746_s5 = scalar_lea.hbm %s804_s1, %s474_s25 }
  0x2a   : > { %s157_s6 = scalar_lea.vmem [#allocation5], %s457_s24  ;;  %s154_s27 = scalar_lea.sflag [#allocation6], %s690_s22 }
  0x2b   : > { %s812_s23 = scalar_select %p737_p5, 1, 0 }
  0x2c   : > { %s165_s7 = sshll.u32 %s157_s6, 4  ;;  %s555_s29 = scalar_lea.hbm %s746_s5, 256  ;;  %s166_s7 = int_to_ptr.vmem [resolvable:$true] %s165_s7 }
  0x2d   : > { %p556_p9 = scmp.ne.s32.totalorder %s746_s5, %s555_s29  ;;  %s560_s8 = scalar_lea.hbm %s804_s1, 768 }
  0x2e   : > { %p561_p11 = scmp.lt.u32.totalorder %s746_s5, %s804_s1  ;;  %p562_p13 = scmp.lt.u32.totalorder %s560_s8, %s555_s29 }
  0x2f   : > { %p558_p10 = pnand %p556_p9, %p527_p12  ;;  %p564_p2 = scmp.lt.u32.totalorder %s555_s29, %s746_s5 }
  0x30   : > { %p563_p1 = por %p562_p13, %p561_p11 }
  0x31   : > { %p559_p6 = pneg %p558_p10 }
  0x32   : > { %p565_p3 = por %p564_p2, %p563_p1 }
  0x34   : > { %p566_p0 = pnand %p565_p3, %p559_p6 }
  0x36   : > { %569 = shalt.err (!%p566_p0)
}
  0x37   : > { %s570_s22 = scalar_lea.vmem %s166_s7, 256  ;;  %s626_s11 = smov [#allocation5]  }
  0x38   : > { %p571_p4 = scmp.ne.s32.totalorder %s166_s7, %s570_s22  ;;  %s575_s12 = sshll.u32 %s626_s11, 4  ;;  %s576_s12 = int_to_ptr.vmem [resolvable:$false] %s575_s12 }
  0x39   : > { %s577_s18 = scalar_lea.vmem %s576_s12, 512  ;;  %p578_p7 = scmp.lt.s32.totalorder %s166_s7, %s576_s12 }
  0x3a   : > { %p573_p9 = pnand %p571_p4, %p527_p12  ;;  %p579_p5 = scmp.lt.s32.totalorder %s577_s18, %s570_s22 }
  0x3c   : > { %p574_p10 = pneg %p573_p9  ;;  %p580_p11 = por %p579_p5, %p578_p7 }
  0x3e   : > { %p581_p13 = pnand %p580_p11, %p574_p10 }
  0x40   : > { %584 = shalt.err (!%p581_p13)
}
  0x41   : > { %485 = dma.hbm_to_vmem [thread:$0]  (!%p701_p8), %s746_s5, 256, %s166_s7, %s154_s27  }
  0x42   : > { %p813_p6 = scmp.ne.s32.totalorder %s812_s23, 0 }
  0x43   : > { %s176_s19 = sand.u32 (!%p813_p6), 1, %s615_s13   ;;  %p814_p12 = scmp.ne.s32.totalorder (!%p813_p6), %s808_s21, 0 }
  0x44   : > { %174 = sbr.rel (%p813_p6) target bundleno = 770 (0x302), region = 32  ;;  %s461_s24 = sshll.u32 (!%p813_p6), %s176_s19, 2 }
  0x45   : > { %s177_s25 = scalar_lea.sflag (!%p813_p6), [#allocation4], %s176_s19  ;;  %s180_s26 = scalar_lea.vmem (!%p813_p6), [#allocation3], %s461_s24 }
  0x4b   : > { %602 = dma.done.wait (%p814_p12), %s177_s25, 64  }
  0x4c   : > { %604 = vsyncadd (%p814_p12), %s177_s25, 4294967232  ;;  %s462_s28 = sshll.u32 %s176_s19, 4  ;;  %s186_s6 = scalar_lea.sflag [#allocation6], %s176_s19 }
  0x4d   : > { %s189_s30 = scalar_lea.vmem [#allocation5], %s462_s28 }
  0x4e   : > { %606 = dma.done.wait (%p814_p12), %s186_s6, 256  }
  0x4f   : > { %608 = vsyncadd (%p814_p12), %s186_s6, 4294967040  ;;  %p463_p7 = scmp.ne.s32.totalorder %s668_s16, 0 }
  0x50   : > { %vm219_vm0 = vcmask (!%p463_p7), 58368   ;;  %v627_v0 = vmov (!%p463_p7), 0.0  }
  0x51   : > { %218 = sbr.rel (%p463_p7) target bundleno = 88 (0x58), region = 44  ;;  %220 = vst.msk [vmem:[#allocation2] sm:$0x3] (!%p463_p7), %vm219_vm0, %v627_v0 }
  0x58 PF: > { %v223_v1 = vld [vmem:[%s189_s30] sm:$0xff]  ;;  %v224_v2 = vld [vmem:[%s189_s30 + $0x8] sm:$0xff]  ;;  %v237_v3 = vlaneseq  ;;  %v628_v9 = vmov 1966171168   ;;  %vm349_vm1 = vcmask 58368   ;;  %p469_p8 = scmp.ne.s32.totalorder %s668_s16, 2 }
  0x59   : > { %v466_v4 = vcombine.high %v223_v1, %v223_v1  ;;  %v465_v5 = vcombine.low %v223_v1, %v223_v1  ;;  %v468_v6 = vcombine.high %v224_v2, %v224_v2  ;;  %v467_v7 = vcombine.low %v224_v2, %v224_v2  ;;  %v464_v8 = vld.sshfl [vmem:[%s180_s26] sm:$0x33 pattern:$0x75316420]  ;;  %v221_v21 = vld [vmem:[#allocation2] sm:$0x3] }
  0x5a   : > { %v235_v10 = vunpack.c.l.s4 %v628_v9  ;;  %v238_v11 = vshrl.u32 %v237_v3, 7  ;;  %v233_v12 = vcombine.high %v464_v8, %v464_v8  ;;  %v470_v30 = vld [vmem:[%s805_s2] ss:$0 sm:$0xff] (!%p469_p8)  ;;  %v369_v35 = vand.u32 (!%p469_p8), 127, %v237_v3 }
  0x5b   : > { %268 = vmatprep.subr.bf16.mxu0 %v466_v4  ;;  %308 = vmatprep.subr.bf16.mxu1 %v468_v6  ;;  %vm387_vm4 = vcmask (!%p469_p8), 1024  }
  0x5c   : > { %269 = vmatpush1.bf16.xpose.msra.mxu0 %v465_v5  ;;  %309 = vmatpush1.bf16.xpose.msra.mxu1 %v467_v7  ;;  %v236_v13 = vunpack.c.0.s8 %v235_v10 }
  0x5e   : > { %v239_v14 = vsub.s32 %v236_v13, %v238_v11 }
  0x60   : > { %v247_v15 = vrot.slane %v233_v12, %v239_v14  ;;  %v240_v16 = vrot.slane %v464_v8, %v239_v14 }
  0x62   : > { %300 = vmatprep.mubr.bf16.mxu0 %v247_v15  ;;  %v249_v17 = vcombine.high %v247_v15, %v247_v15  ;;  %v248_v18 = vcombine.high %v240_v16, %v240_v16 }
  0x63   : > { %301 = vmatmul.mubr.bf16.vlgmr.msra.gmra.mrb[0].mxu0 %v240_v16 }
  0x64   : > { %340 = vmatprep.mubr.bf16.mxu1 %v249_v17 }
  0x65   : > { %341 = vmatmul.mubr.bf16.vlgmr.msra.gmra.mrb[0].mxu1 %v248_v18 }
 0x136   : > { %v302_v19 = vpop.f32.mrb[0].mxu0 }
 0x137   : > { %v304_v20 = vpop.f32.mrb[1].mxu0  ;;  %354 = sbr.rel (%p469_p8) target bundleno = 770 (0x302), region = 48 }
 0x138   : > { %v342_v22 = vpop.f32.mrb[0].mxu1  ;;  %v305_v23 = vpop.f32.mrb[2].mxu0 }
 0x139   : > { %v343_v24 = vadd.f32 %v342_v22, %v302_v19  ;;  %v344_v25 = vpop.f32.mrb[1].mxu1  ;;  %v306_v26 = vpop.f32.mrb[3].mxu0 }
 0x13a   : > { %v345_v27 = vpop.f32.mrb[2].mxu1 }
 0x13b   : > { %v348_v28 = vadd.f32 %v343_v24, %v221_v21  ;;  %v346_v29 = vpop.f32.mrb[3].mxu1 }
 0x13d   : > { %350 = vst.msk [vmem:[#allocation2] sm:$0x3] %vm349_vm1, %v348_v28 }
 0x144   : > { %v356_v31 = vld [vmem:[#allocation2] sm:$0x3] }
 0x145   : > { %v357_v32 = vmul.f32 2.0, %v356_v31 }
 0x147   : > { %v364_v33 = vsub.f32 %v470_v30, %v357_v32 }
 0x149   : > { %v365_v34 = vsel %vm349_vm1, %v364_v33, inf }
 0x14a   : > { %366 = vmin.xlane.f32.xlu0 %v365_v34 }
 0x1d7   : > { %v367_v36 = vpop.xlane.xlu0 %366 }
 0x1d8   : > { %vm370_vm2 = vcmp.eq.f32.partialorder %v364_v33, %v367_v36 }
 0x1d9   : > { %v371_v37 = vsel %vm370_vm2, %v369_v35, 8 }
 0x1da   : > { %v372_v38 = vsel %vm349_vm1, %v371_v37, 2147483647 }
 0x1db   : > { %v374_v39 = vshra.s32 %v372_v38, 16  ;;  %v373_v41 = vand.u32 65535, %v372_v38 }
 0x1dd   : > { %v376_v40 = vcvt.s32.f32 %v374_v39  ;;  %v375_v43 = vcvt.s32.f32 %v373_v41 }
 0x1df   : > { %377 = vmin.xlane.f32.xlu0 %v376_v40 }
 0x26c   : > { %v378_v42 = vpop.xlane.xlu0 %377 }
 0x26d   : > { %vm379_vm3 = vcmp.eq.f32.partialorder %v376_v40, %v378_v42  ;;  %v384_v45 = vcvt.f32.s32 %v378_v42 }
 0x26e   : > { %v380_v44 = vsel %vm379_vm3, %v375_v43, inf }
 0x26f   : > { %381 = vmin.xlane.f32.xlu1 %v380_v44  ;;  %v385_v47 = vshll.u32 %v384_v45, 16 }
 0x2fc   : > { %v382_v46 = vpop.xlane.xlu1 %381 }
 0x2fd   : > { %v383_v48 = vcvt.f32.s32 %v382_v46 }
 0x2ff   : > { %v386_v49 = vadd.s32 %v385_v47, %v383_v48 }
 0x301   : > { %388 = vst.msk [vmem:[%s806_s3] sm:$0x3] %vm387_vm4, %v386_v49 }
 0x302 PF: > { %p16_p5 = scmp.ge.s32.totalorder %s671_s17, 5   ;;  %s815_s12 = smov %s615_s13 }
 0x303   : > { %s816_s13 = smov %s619_s14  ;;  %s817_s14 = smov %s681_s20 }
 0x304   : > { %s818_s15 = smov %s671_s17  ;;  %18 = sbr.rel (!%p16_p5) target bundleno = 5 (0x5), region = 89 }
 0x30b   :  { %400 = vsyncpa [#allocation4], 1 }
 0x30c   :  { %402 = vsyncpa [#allocation4 + $0x1], 1 }
 0x30d   :  { %403 = vsyncpa [#allocation6], 1 }
 0x30e   :  { %405 = vsyncpa [#allocation6 + $0x1], 1 }

</bundles_post_ra>
